<compile_context>
chip_gen: v7x
topology: tpu7x:2x2x1
jax: 0.10.0
libtpu: 0.0.40
codegen_flags: <defaults>
</compile_context>

<pallas_src>
import jax
import jax.numpy as jnp
from jax.experimental import pallas as pl
from jax.experimental.pallas import tpu as pltpu

_LANE = 128
_SUBLANE = 8


def _round_up(x, m):
    return (x + m - 1) // m * m


def _leaky_relu(x, negative_slope=0.01):
    # F.leaky_relu default negative_slope = 0.01
    return jnp.where(x > 0, x, negative_slope * x)


def _vmem_limit_bytes(estimate):
    # Raise v5e's 16 MiB default scoped VMEM when the tiles need it; stay
    # comfortably under v7x's 64 MiB physical VMEM.
    return int(min(max(int(estimate) + (4 << 20), 16 << 20), 48 << 20))


def _mlp_kernel(x_ref, w1_ref, b1_ref, w2_ref, b2_ref, w3_ref, b3_ref, o_ref):
    # Layer 1: dominant GEMM — bf16 MXU inputs, f32 accumulation.  The f32->
    # bf16 cast of the activations runs on the VPU (free slot under DMA slack).
    x = x_ref[...].astype(w1_ref.dtype)
    h1 = jnp.dot(x, w1_ref[...], preferred_element_type=jnp.float32) + b1_ref[...]
    h1 = _leaky_relu(h1)

    # Layers 2/3: tiny (128x128) GEMMs kept fully in f32 — the kernel is
    # HBM-bound, so this is free and avoids compounding bf16 rounding.
    h2 = jnp.dot(h1, w2_ref[...], preferred_element_type=jnp.float32) + b2_ref[...]
    h2 = _leaky_relu(h2)

    h3 = jnp.dot(h2, w3_ref[...], preferred_element_type=jnp.float32) + b3_ref[...]
    h3 = _leaky_relu(h3)

    # Lane-dense 128-wide store; bf16 halves output HBM writeback.
    o_ref[...] = h3.astype(o_ref.dtype)


def _const_spec(shape):
    # Constant index_map -> weights/biases stay VMEM-resident across grid steps.
    return pl.BlockSpec(shape, lambda i, _n=len(shape): (0,) * _n)


def weak_learner_mlp_forward(x_nchw, params, *, batch_tile=1024,
                             out_dtype=jnp.bfloat16):
    """x_nchw: (B, C, H, W).  Returns (B, n_class) float32 logits."""
    w1, b1, w2, b2, w3, b3 = params
    B = int(x_nchw.shape[0])
    D = 1
    for s in x_nchw.shape[1:]:
        D *= int(s)
    # Same as torch .view(-1, H*W*C) for contiguous NCHW; no data copy.
    x = x_nchw.reshape(B, D).astype(jnp.float32)

    H1 = int(w1.shape[1])
    H2 = int(w2.shape[1])
    n_class = int(w3.shape[1])
    N_pad = _round_up(n_class, _LANE)  # lane-dense output width
    out_itemsize = jnp.dtype(out_dtype).itemsize

    # Weights: w1 in bf16 (dominant GEMM), w2/w3/biases in f32 (accuracy, tiny).
    # Zero-padding w3/b3 columns is numerically exact (leaky_relu(0)=0, sliced off).
    w1c = w1.astype(jnp.bfloat16)
    w2f = w2.astype(jnp.float32)
    w3p = jnp.zeros((H2, N_pad), jnp.float32).at[:, :n_class].set(
        w3.astype(jnp.float32))
    b1f = b1.reshape(1, H1).astype(jnp.float32)
    b2f = b2.reshape(1, H2).astype(jnp.float32)
    b3p = jnp.zeros((1, N_pad), jnp.float32).at[:, :n_class].set(
        b3.reshape(1, n_class).astype(jnp.float32))

    # ---- Batch tile (M) selection ---------------------------------------
    if B <= 2 * _SUBLANE:
        # Tiny batch: one block covering the whole batch (block dim == array
        # dim, so no 8-row alignment requirement and no padding at all).
        TB = B
    else:
        # Aim for >= 2 grid steps (keeps both v7x TensorCores busy), keep the
        # MXU M a multiple of 256 when the batch allows, cap at batch_tile
        # (mem-bound tiling sweep: 512-1024 wide tiles ~ 85% of HBM roofline).
        half = pl.cdiv(B, 2)
        if half >= 256:
            TB = min(int(batch_tile), _round_up(half, 256))
        else:
            TB = _round_up(half, _SUBLANE)
        TB = min(TB, _round_up(B, _SUBLANE))

    # ---- VMEM budget: shrink TB if tiles + resident weights overflow ------
    # Pallas double-buffers every input/output block (2 buffers each).
    w_bytes = 2 * (w1c.size * 2 + (w2f.size + w3p.size) * 4
                   + (b1f.size + b2f.size + b3p.size) * 4)

    def _tiles_bytes(tb):
        return 2 * tb * D * 4 + 2 * tb * N_pad * out_itemsize

    VMEM_BUDGET = 24 << 20  # conservative: fits v5e/v6e/v7x scoped VMEM
    while TB > _SUBLANE and w_bytes + _tiles_bytes(TB) > VMEM_BUDGET:
        TB = max(_SUBLANE, _round_up(TB // 2, _SUBLANE))

    nb = pl.cdiv(B, TB)  # boundary block (if any) is masked by Pallas
    vmem_est = w_bytes + _tiles_bytes(TB)

    flops = 2 * B * (D * H1 + H1 * H2 + H2 * N_pad)
    bytes_accessed = (B * D * 4
                      + w1c.size * 2 + (w2f.size + w3p.size) * 4
                      + (b1f.size + b2f.size + b3p.size) * 4
                      + B * N_pad * out_itemsize)
    cost = pl.CostEstimate(flops=int(flops), transcendentals=0,
                           bytes_accessed=int(bytes_accessed))

    out = pl.pallas_call(
        _mlp_kernel,
        out_shape=jax.ShapeDtypeStruct((B, N_pad), out_dtype),
        grid=(nb,),
        in_specs=[
            pl.BlockSpec((TB, D), lambda i: (i, 0)),   # x: tiled over batch, f32
            _const_spec((D, H1)), _const_spec((1, H1)),
            _const_spec((H1, H2)), _const_spec((1, H2)),
            _const_spec((H2, N_pad)), _const_spec((1, N_pad)),
        ],
        out_specs=pl.BlockSpec((TB, N_pad), lambda i: (i, 0)),
        compiler_params=pltpu.CompilerParams(
            dimension_semantics=("parallel",),          # megacore sharding on v7x
            vmem_limit_bytes=_vmem_limit_bytes(vmem_est)),
        cost_estimate=cost,
    )(x, w1c, b1f, w2f, b2f, w3p, b3p)

    # Column slice (bf16, half the read of f32) + upcast of the tiny result.
    return out[:, :n_class].astype(jnp.float32)


def weak_learner_mlp_forward_stacked(x_nchw, stacked_params, *,
                                     out_dtype=jnp.bfloat16):
    """Evaluate L weak learners on the same (small) batch in ONE pallas_call.

    stacked_params: (w1s (L,D,H1), b1s (L,1,H1), w2s (L,H1,H2), b2s (L,1,H2),
                     w3s (L,H2,n_class), b3s (L,1,n_class)).
    Returns (L, B, n_class) float32.  Intended for the boosting use case
    (B ~ 2): the grid iterates over learners, x stays VMEM-resident, and the
    kernel becomes weight-read-bound instead of launch-overhead-bound.
    """
    w1s, b1s, w2s, b2s, w3s, b3s = stacked_params
    L, D_w, H1 = (int(s) for s in w1s.shape)
    H2 = int(w2s.shape[2])
    n_class = int(w3s.shape[2])
    B = int(x_nchw.shape[0])
    D = 1
    for s in x_nchw.shape[1:]:
        D *= int(s)
    assert D == D_w, "stacked w1 in-dim must match flattened input dim"
    x = x_nchw.reshape(B, D).astype(jnp.float32)
    N_pad = _round_up(n_class, _LANE)
    out_itemsize = jnp.dtype(out_dtype).itemsize

    w1c = w1s.astype(jnp.bfloat16)
    w2f = w2s.astype(jnp.float32)
    w3p = jnp.zeros((L, H2, N_pad), jnp.float32).at[:, :, :n_class].set(
        w3s.astype(jnp.float32))
    b1f = b1s.reshape(L, 1, H1).astype(jnp.float32)
    b2f = b2s.reshape(L, 1, H2).astype(jnp.float32)
    b3p = jnp.zeros((L, 1, N_pad), jnp.float32).at[:, :, :n_class].set(
        b3s.reshape(L, 1, n_class).astype(jnp.float32))

    def per_l(shape):
        # Leading learner dim is squeezed; kernel sees the same 2-D refs as
        # the single-learner kernel, so _mlp_kernel is reused as-is.
        return pl.BlockSpec((None,) + shape,
                            lambda l, _n=len(shape): (l,) + (0,) * _n)

    per_learner_w = (D * H1 * 2 + (H1 * H2 + H2 * N_pad) * 4
                     + (H1 + H2 + N_pad) * 4)
    vmem_est = 2 * per_learner_w + 2 * B * D * 4 + 2 * B * N_pad * out_itemsize

    flops = 2 * L * B * (D * H1 + H1 * H2 + H2 * N_pad)
    bytes_accessed = (B * D * 4 + L * per_learner_w + L * B * N_pad * out_itemsize)
    cost = pl.CostEstimate(flops=int(flops), transcendentals=0,
                           bytes_accessed=int(bytes_accessed))

    # TODO(synk): for large B this path should also tile the batch on a second
    # grid axis; current boosting workloads keep B tiny so one block suffices.
    out = pl.pallas_call(
        _mlp_kernel,
        out_shape=jax.ShapeDtypeStruct((L, B, N_pad), out_dtype),
        grid=(L,),
        in_specs=[
            pl.BlockSpec((B, D), lambda l: (0, 0)),     # shared x, VMEM-resident
            per_l((D, H1)), per_l((1, H1)),
            per_l((H1, H2)), per_l((1, H2)),
            per_l((H2, N_pad)), per_l((1, N_pad)),
        ],
        out_specs=pl.BlockSpec((None, B, N_pad), lambda l: (l, 0, 0)),
        compiler_params=pltpu.CompilerParams(
            dimension_semantics=("parallel",),
            vmem_limit_bytes=_vmem_limit_bytes(vmem_est)),
        cost_estimate=cost,
    )(x, w1c, b1f, w2f, b2f, w3p, b3p)

    return out[:, :, :n_class].astype(jnp.float32)


def init_params(key, height, width, n_class, n_channel=1, hidden_size=(128, 128)):
    """Deterministic init mirroring the module's __init__.

    Weights: normal(0, std) with the module's custom std; biases follow
    torch.nn.Linear's default U(-1/sqrt(fan_in), 1/sqrt(fan_in)).
    Weights are returned transposed to (in, out)."""
    d_in = height * width * n_channel
    h1, h2 = hidden_size
    ks = jax.random.split(key, 6)

    std1 = 1.0 / width / height / n_channel
    std2 = 1.0 / h1
    std3 = 1.0 / h2

    w1 = std1 * jax.random.normal(ks[0], (d_in, h1), jnp.float32)
    w2 = std2 * jax.random.normal(ks[1], (h1, h2), jnp.float32)
    w3 = std3 * jax.random.normal(ks[2], (h2, n_class), jnp.float32)

    def unif(k, fan_in, n):
        bound = 1.0 / jnp.sqrt(jnp.float32(fan_in))
        return jax.random.uniform(k, (1, n), jnp.float32, -bound, bound)

    b1 = unif(ks[3], d_in, h1)
    b2 = unif(ks[4], h1, h2)
    b3 = unif(ks[5], h2, n_class)
    return (w1, b1, w2, b2, w3, b3)


def reference_forward(x_nchw, params):
    w1, b1, w2, b2, w3, b3 = params
    x = x_nchw.reshape(x_nchw.shape[0], -1)
    h = _leaky_relu(x @ w1 + b1)
    h = _leaky_relu(h @ w2 + b2)
    return _leaky_relu(h @ w3 + b3)


if __name__ == "__main__":
    # Small shapes consistent with the module: B=2, C=1, H=W=16, n_class=10.
    B, C, H, W = 2, 1, 16, 16
    n_class = 10
    hidden = (128, 128)

    key = jax.random.PRNGKey(0)
    kx, kp = jax.random.split(key)
    x = jax.random.normal(kx, (B, C, H, W), jnp.float32)
    params = init_params(kp, H, W, n_class, n_channel=C, hidden_size=hidden)

    out = jax.block_until_ready(weak_learner_mlp_forward(x, params))
    ref = reference_forward(x, params)
    assert out.shape == (B, n_class)
    # bf16 first GEMM + bf16 output store: loosened tolerance vs f32 reference.
    assert jnp.allclose(out, ref, atol=2e-2, rtol=2e-2), "mismatch vs JAX reference"

    # Stacked-learner path (the actual boosting shape: many learners, tiny B).
    L = 4
    learner_keys = jax.random.split(jax.random.PRNGKey(1), L)
    plist = [init_params(k, H, W, n_class, n_channel=C, hidden_size=hidden)
             for k in learner_keys]
    stacked = tuple(jnp.stack([p[i] for p in plist]) for i in range(6))
    outs = jax.block_until_ready(weak_learner_mlp_forward_stacked(x, stacked))
    refs = jnp.stack([reference_forward(x, p) for p in plist])
    assert outs.shape == (L, B, n_class)
    assert jnp.allclose(outs, refs, atol=2e-2, rtol=2e-2), "stacked mismatch"

    print("KERNEL_OK")
</pallas_src>

<mosaic_0001>
module attributes {stable_mosaic.version = 11 : i64} {
  func.func @_mlp_kernel(%arg0: i32, %arg1: memref<2x256xf32, #tpu.memory_space<vmem>>, %arg2: memref<256x128xbf16, #tpu.memory_space<vmem>>, %arg3: memref<1x128xf32, #tpu.memory_space<vmem>>, %arg4: memref<128x128xf32, #tpu.memory_space<vmem>>, %arg5: memref<1x128xf32, #tpu.memory_space<vmem>>, %arg6: memref<128x128xf32, #tpu.memory_space<vmem>>, %arg7: memref<1x128xf32, #tpu.memory_space<vmem>>, %arg8: memref<2x128xbf16, #tpu.memory_space<vmem>>) attributes {dimension_semantics = [#tpu.dimension_semantics<parallel>], iteration_bounds = array<i64: 1>, scalar_prefetch = 0 : i64, scratch_operands = 0 : i64, tpu.core_type = #tpu.core_type<tc>, window_params = [{transform_indices = @transform_0, window_bounds = array<i64: 2, 256>}, {pipeline_mode = #tpu.pipeline_mode<synchronous>, transform_indices = @transform_1, window_bounds = array<i64: 256, 128>}, {pipeline_mode = #tpu.pipeline_mode<synchronous>, transform_indices = @transform_2, window_bounds = array<i64: 1, 128>}, {pipeline_mode = #tpu.pipeline_mode<synchronous>, transform_indices = @transform_3, window_bounds = array<i64: 128, 128>}, {pipeline_mode = #tpu.pipeline_mode<synchronous>, transform_indices = @transform_4, window_bounds = array<i64: 1, 128>}, {pipeline_mode = #tpu.pipeline_mode<synchronous>, transform_indices = @transform_5, window_bounds = array<i64: 128, 128>}, {pipeline_mode = #tpu.pipeline_mode<synchronous>, transform_indices = @transform_6, window_bounds = array<i64: 1, 128>}, {transform_indices = @transform_7, window_bounds = array<i64: 2, 128>}]} {
    %c0 = arith.constant 0 : index
    %c0_0 = arith.constant 0 : index
    %0 = vector.load %arg1[%c0, %c0_0] : memref<2x256xf32, #tpu.memory_space<vmem>>, vector<2x256xf32>
    %1 = arith.truncf %0 : vector<2x256xf32> to vector<2x256xbf16>
    %c0_1 = arith.constant 0 : index
    %c0_2 = arith.constant 0 : index
    %2 = vector.load %arg2[%c0_1, %c0_2] : memref<256x128xbf16, #tpu.memory_space<vmem>>, vector<256x128xbf16>
    %cst = arith.constant dense<0.000000e+00> : vector<2x128xf32>
    %3 = tpu.matmul %1, %2, %cst {dimension_numbers = #tpu.dot_dimension_numbers<[1], [0], [0], [1], [0, 0, 1, 1], [], []>} : vector<2x256xbf16>, vector<256x128xbf16>, vector<2x128xf32> -> vector<2x128xf32>
    %c0_3 = arith.constant 0 : index
    %c0_4 = arith.constant 0 : index
    %4 = vector.load %arg3[%c0_3, %c0_4] : memref<1x128xf32, #tpu.memory_space<vmem>>, vector<1x128xf32>
    %5 = vector.broadcast %4 : vector<1x128xf32> to vector<2x128xf32>
    %6 = arith.addf %3, %5 : vector<2x128xf32>
    %cst_5 = arith.constant 0.000000e+00 : f32
    %7 = vector.broadcast %cst_5 : f32 to vector<2x128xf32>
    %8 = arith.cmpf ogt, %6, %7 : vector<2x128xf32>
    %cst_6 = arith.constant 0.00999999977 : f32
    %9 = vector.broadcast %cst_6 : f32 to vector<2x128xf32>
    %10 = arith.mulf %9, %6 : vector<2x128xf32>
    %11 = arith.select %8, %6, %10 : vector<2x128xi1>, vector<2x128xf32>
    %c0_7 = arith.constant 0 : index
    %c0_8 = arith.constant 0 : index
    %12 = vector.load %arg4[%c0_7, %c0_8] : memref<128x128xf32, #tpu.memory_space<vmem>>, vector<128x128xf32>
    %cst_9 = arith.constant dense<0.000000e+00> : vector<2x128xf32>
    %13 = tpu.matmul %11, %12, %cst_9 {dimension_numbers = #tpu.dot_dimension_numbers<[1], [0], [0], [1], [0, 0, 1, 1], [], []>} : vector<2x128xf32>, vector<128x128xf32>, vector<2x128xf32> -> vector<2x128xf32>
    %c0_10 = arith.constant 0 : index
    %c0_11 = arith.constant 0 : index
    %14 = vector.load %arg5[%c0_10, %c0_11] : memref<1x128xf32, #tpu.memory_space<vmem>>, vector<1x128xf32>
    %15 = vector.broadcast %14 : vector<1x128xf32> to vector<2x128xf32>
    %16 = arith.addf %13, %15 : vector<2x128xf32>
    %cst_12 = arith.constant 0.000000e+00 : f32
    %17 = vector.broadcast %cst_12 : f32 to vector<2x128xf32>
    %18 = arith.cmpf ogt, %16, %17 : vector<2x128xf32>
    %cst_13 = arith.constant 0.00999999977 : f32
    %19 = vector.broadcast %cst_13 : f32 to vector<2x128xf32>
    %20 = arith.mulf %19, %16 : vector<2x128xf32>
    %21 = arith.select %18, %16, %20 : vector<2x128xi1>, vector<2x128xf32>
    %c0_14 = arith.constant 0 : index
    %c0_15 = arith.constant 0 : index
    %22 = vector.load %arg6[%c0_14, %c0_15] : memref<128x128xf32, #tpu.memory_space<vmem>>, vector<128x128xf32>
    %cst_16 = arith.constant dense<0.000000e+00> : vector<2x128xf32>
    %23 = tpu.matmul %21, %22, %cst_16 {dimension_numbers = #tpu.dot_dimension_numbers<[1], [0], [0], [1], [0, 0, 1, 1], [], []>} : vector<2x128xf32>, vector<128x128xf32>, vector<2x128xf32> -> vector<2x128xf32>
    %c0_17 = arith.constant 0 : index
    %c0_18 = arith.constant 0 : index
    %24 = vector.load %arg7[%c0_17, %c0_18] : memref<1x128xf32, #tpu.memory_space<vmem>>, vector<1x128xf32>
    %25 = vector.broadcast %24 : vector<1x128xf32> to vector<2x128xf32>
    %26 = arith.addf %23, %25 : vector<2x128xf32>
    %cst_19 = arith.constant 0.000000e+00 : f32
    %27 = vector.broadcast %cst_19 : f32 to vector<2x128xf32>
    %28 = arith.cmpf ogt, %26, %27 : vector<2x128xf32>
    %cst_20 = arith.constant 0.00999999977 : f32
    %29 = vector.broadcast %cst_20 : f32 to vector<2x128xf32>
    %30 = arith.mulf %29, %26 : vector<2x128xf32>
    %31 = arith.select %28, %26, %30 : vector<2x128xi1>, vector<2x128xf32>
    %32 = arith.truncf %31 : vector<2x128xf32> to vector<2x128xbf16>
    %c0_21 = arith.constant 0 : index
    %c0_22 = arith.constant 0 : index
    %33 = vector.load %arg8[%c0_21, %c0_22] : memref<2x128xbf16, #tpu.memory_space<vmem>>, vector<2x128xbf16>
    tpu.vector_store %arg8[%c0_21, %c0_22], %32 {strides = array<i32>} : memref<2x128xbf16, #tpu.memory_space<vmem>>, vector<2x128xbf16>,
    return
  }
  func.func @transform_0(%arg0: i32) -> (i32, i32) {
    %c0_i32 = arith.constant 0 : i32
    %c0_i32_0 = arith.constant 0 : i32
    return %arg0, %c0_i32 : i32, i32
  }
  func.func @transform_1(%arg0: i32) -> (i32, i32) {
    %c0_i32 = arith.constant 0 : i32
    %c0_i32_0 = arith.constant 0 : i32
    %c0_i32_1 = arith.constant 0 : i32
    return %c0_i32, %c0_i32_0 : i32, i32
  }
  func.func @transform_2(%arg0: i32) -> (i32, i32) {
    %c0_i32 = arith.constant 0 : i32
    %c0_i32_0 = arith.constant 0 : i32
    %c0_i32_1 = arith.constant 0 : i32
    return %c0_i32, %c0_i32_0 : i32, i32
  }
  func.func @transform_3(%arg0: i32) -> (i32, i32) {
    %c0_i32 = arith.constant 0 : i32
    %c0_i32_0 = arith.constant 0 : i32
    %c0_i32_1 = arith.constant 0 : i32
    return %c0_i32, %c0_i32_0 : i32, i32
  }
  func.func @transform_4(%arg0: i32) -> (i32, i32) {
    %c0_i32 = arith.constant 0 : i32
    %c0_i32_0 = arith.constant 0 : i32
    %c0_i32_1 = arith.constant 0 : i32
    return %c0_i32, %c0_i32_0 : i32, i32
  }
  func.func @transform_5(%arg0: i32) -> (i32, i32) {
    %c0_i32 = arith.constant 0 : i32
    %c0_i32_0 = arith.constant 0 : i32
    %c0_i32_1 = arith.constant 0 : i32
    return %c0_i32, %c0_i32_0 : i32, i32
  }
  func.func @transform_6(%arg0: i32) -> (i32, i32) {
    %c0_i32 = arith.constant 0 : i32
    %c0_i32_0 = arith.constant 0 : i32
    %c0_i32_1 = arith.constant 0 : i32
    return %c0_i32, %c0_i32_0 : i32, i32
  }
  func.func @transform_7(%arg0: i32) -> (i32, i32) {
    %c0_i32 = arith.constant 0 : i32
    %c0_i32_0 = arith.constant 0 : i32
    return %arg0, %c0_i32 : i32, i32
  }
}

</mosaic_0001>

<bundles_post_ra>
// kernel: tpu_custom_call.1
= control target key start
LH: loop header
LB: loop body
LE: loop exit
PB: predicated region body
PF: predicated region fallthrough
CT: control target
= control target key end

     0   :  { %12 = vsyncpa [#allocation3], 0  ;;  %s961_s0 = inlined_call_operand.hbm [shape: f32[2,256], index: 0, kind: input, shape index: {}]   ;;  %s962_s1 = inlined_call_operand.hbm [shape: bf16[256,128], index: 1, kind: input, shape index: {}]   ;;  %s963_s2 = inlined_call_operand.vmem [shape: f32[1,128], index: 2, kind: input, shape index: {}]   ;;  %s964_s3 = inlined_call_operand.hbm [shape: f32[128,128], index: 3, kind: input, shape index: {}]   ;;  %s965_s4 = inlined_call_operand.vmem [shape: f32[1,128], index: 4, kind: input, shape index: {}]   ;;  %s966_s5 = inlined_call_operand.hbm [shape: f32[128,128], index: 5, kind: input, shape index: {}]   ;;  %s967_s6 = inlined_call_operand.vmem [shape: f32[1,128], index: 6, kind: input, shape index: {}]   ;;  %s968_s7 = inlined_call_operand.hbm [shape: bf16[2,128], index: 7, kind: output, shape index: {}]  }
   0x1   :  { %13 = vsyncpa [#allocation6], 0 }
   0x2   :  { %14 = vsyncpa [#allocation9], 0 }
   0x3   :  { %15 = vsyncpa [#allocation4], 0  ;;  %s824_s24 = smov [#allocation5]   ;;  %s706_s28 = scalar_lea.hbm %s962_s1, 2048 }
   0x4   :  { %s31_s25 = sshll.u32 %s824_s24, 4  ;;  %p707_p0 = scmp.ne.s32.totalorder %s962_s1, %s706_s28  ;;  %s32_s25 = int_to_ptr.vmem [resolvable:$true] %s31_s25 }
   0x5   :  { %p710_p1 = scmp.lt.u32.totalorder %s706_s28, %s962_s1 }
   0x7   :  { %p712_p2 = pnand %p710_p1, %p707_p0 }
   0x9   :  { %715 = shalt.err (!%p712_p2)
}
   0xa   :  { %s716_s10 = scalar_lea.vmem %s32_s25, 2048  ;;  %p721_p4 = scmp.lt.s32.totalorder %s32_s25, %s32_s25 }
   0xb   :  { %p717_p3 = scmp.ne.s32.totalorder %s32_s25, %s716_s10  ;;  %p722_p5 = scmp.lt.s32.totalorder %s716_s10, %s716_s10 }
   0xd   :  { %p723_p6 = por %p722_p5, %p721_p4 }
   0xf   :  { %p724_p7 = pnand %p723_p6, %p717_p3 }
  0x11   :  { %727 = shalt.err (!%p724_p7)
}
  0x12   :  { %s825_s11 = smov 64   ;;  %s826_s12 = smov 4  }
  0x13   :  { %37 = dma.hbm_to_vmem [thread:$0]  %s962_s1, 2048, %s32_s25, [#allocation6], %s825_s11, %s825_s11, %s826_s12  }
  0x14   :  { %s827_s15 = smov [#allocation2]   ;;  %s828_s17 = smov [#allocation7]  }
  0x15   :  { %s22_s16 = sshll.u32 %s827_s15, 4  ;;  %s45_s18 = sshll.u32 %s828_s17, 4  ;;  %s23_s16 = int_to_ptr.vmem [resolvable:$true] %s22_s16  ;;  %s46_s18 = int_to_ptr.vmem [resolvable:$true] %s45_s18 }
  0x16   :  { %s728_s21 = scalar_lea.hbm %s961_s0, 64 }
  0x17   :  { %p729_p8 = scmp.ne.s32.totalorder %s961_s0, %s728_s21  ;;  %p732_p9 = scmp.lt.u32.totalorder %s728_s21, %s961_s0 }
  0x19   :  { %p734_p10 = pnand %p732_p9, %p729_p8 }
  0x1b   :  { %737 = shalt.err (!%p734_p10)
}
  0x1c   :  { %s738_s1 = scalar_lea.vmem %s23_s16, 64  ;;  %p743_p12 = scmp.lt.s32.totalorder %s23_s16, %s23_s16 }
  0x1d   :  { %p739_p11 = scmp.ne.s32.totalorder %s23_s16, %s738_s1  ;;  %p744_p13 = scmp.lt.s32.totalorder %s738_s1, %s738_s1 }
  0x1f   :  { %p745_p0 = por %p744_p13, %p743_p12 }
  0x21   :  { %p746_p1 = pnand %p745_p0, %p739_p11 }
  0x23   :  { %749 = shalt.err (!%p746_p1)
}
  0x24   :  { %25 = dma.hbm_to_vmem [thread:$0]  %s961_s0, 64, %s23_s16, [#allocation3]  }
  0x25   :  { %s750_s30 = scalar_lea.hbm %s964_s3, 2048 }
  0x26   :  { %p751_p2 = scmp.ne.s32.totalorder %s964_s3, %s750_s30  ;;  %p754_p3 = scmp.lt.u32.totalorder %s750_s30, %s964_s3 }
  0x28   :  { %p756_p4 = pnand %p754_p3, %p751_p2 }
  0x2a   :  { %759 = shalt.err (!%p756_p4)
}
  0x2b   :  { %s760_s12 = scalar_lea.vmem %s46_s18, 2048  ;;  %p765_p6 = scmp.lt.s32.totalorder %s46_s18, %s46_s18 }
  0x2c   :  { %p761_p5 = scmp.ne.s32.totalorder %s46_s18, %s760_s12  ;;  %p766_p7 = scmp.lt.s32.totalorder %s760_s12, %s760_s12 }
  0x2e   :  { %p767_p8 = por %p766_p7, %p765_p6 }
  0x30   :  { %p768_p9 = pnand %p767_p8, %p761_p5 }
  0x32   :  { %771 = shalt.err (!%p768_p9)
}
  0x33   :  { %s829_s0 = smov 128   ;;  %s830_s13 = smov 8  }
  0x34   :  { %51 = dma.hbm_to_vmem [thread:$0]  %s964_s3, 2048, %s46_s18, [#allocation6], %s829_s0, %s829_s0, %s830_s13  }
  0x35   :  { %s831_s16 = smov [#allocation8]   ;;  %s772_s21 = scalar_lea.hbm %s966_s5, 2048 }
  0x36   :  { %s59_s17 = sshll.u32 %s831_s16, 4  ;;  %p773_p10 = scmp.ne.s32.totalorder %s966_s5, %s772_s21  ;;  %s60_s17 = int_to_ptr.vmem [resolvable:$true] %s59_s17 }
  0x37   :  { %p776_p11 = scmp.lt.u32.totalorder %s772_s21, %s966_s5 }
  0x39   :  { %p778_p12 = pnand %p776_p11, %p773_p10 }
  0x3b   :  { %781 = shalt.err (!%p778_p12)
}
  0x3c   :  { %s782_s1 = scalar_lea.vmem %s60_s17, 2048  ;;  %p787_p0 = scmp.lt.s32.totalorder %s60_s17, %s60_s17 }
  0x3d   :  { %p783_p13 = scmp.ne.s32.totalorder %s60_s17, %s782_s1  ;;  %p788_p1 = scmp.lt.s32.totalorder %s782_s1, %s782_s1 }
  0x3f   :  { %p789_p2 = por %p788_p1, %p787_p0 }
  0x41   :  { %p790_p3 = pnand %p789_p2, %p783_p13 }
  0x43   :  { %793 = shalt.err (!%p790_p3)
}
  0x44   :  { %65 = dma.hbm_to_vmem [thread:$0]  %s966_s5, 2048, %s60_s17, [#allocation9], %s829_s0, %s829_s0, %s830_s13  }
  0x45   :  { %816 = dma.done.wait [#allocation3], 64  }
  0x46   :  { %817 = vsyncadd [#allocation3], 4294967232 }
  0x47   :  { %818 = dma.done.wait [#allocation6], 4096  }
  0x48   :  { %819 = vsyncadd [#allocation6], 4294963200 }
  0x49   :  { %820 = dma.done.wait [#allocation9], 2048  }
  0x4a   :  { %821 = vsyncadd [#allocation9], 4294965248  ;;  %v832_v0 = vmov 0.0|0.0   ;;  %v690_v1 = vld [vmem:[#allocation5 + $0x40] sm:$0xff]   ;;  %v692_v3 = vld [vmem:[#allocation5 + $0x48] sm:$0xff]   ;;  %vm833_vm0 = vmmov 0  }
  0x4b   :  { %630 = vmatprep.subr.bf16.mxu1 %v832_v0  ;;  %v691_v2 = vld [vmem:[#allocation5] sm:$0xff]   ;;  %504 = vmatprep.subr.bf16.mxu0 %v690_v1  ;;  %v693_v4 = vld [vmem:[#allocation5 + $0x8] sm:$0xff]   ;;  %v694_v5 = vld [vmem:[#allocation5 + $0x50] sm:$0xff]   ;;  %v834_v45 = vmov 0.0   ;;  %s835_s30 = smov [#allocation10]  }
  0x4c   :  { %505 = vmatpush3.bf16.msra.mxu0 %v691_v2  ;;  %v695_v6 = vld [vmem:[#allocation5 + $0x10] sm:$0xff]   ;;  %v696_v7 = vld [vmem:[#allocation5 + $0x58] sm:$0xff]   ;;  %v698_v9 = vld [vmem:[#allocation5 + $0x60] sm:$0xff]   ;;  %592 = vmatprep.mubr.msk.f32.mxu1 %vm833_vm0, %v834_v45  ;;  %s473_s8 = sshll.u32 %s835_s30, 4  ;;  %s474_s8 = int_to_ptr.vmem [resolvable:$true] %s473_s8 }
  0x4d   :  { %506 = vmatprep.subr.bf16.mxu0 %v692_v3  ;;  %v697_v8 = vld [vmem:[#allocation5 + $0x18] sm:$0xff]   ;;  %v699_v10 = vld [vmem:[#allocation5 + $0x20] sm:$0xff]   ;;  %v700_v11 = vld [vmem:[#allocation5 + $0x68] sm:$0xff]   ;;  %s798_s9 = scalar_lea.vmem %s474_s8, 32  ;;  %p799_p5 = scmp.lt.s32.totalorder %s474_s8, %s474_s8 }
  0x4e   :  { %v484_v12 = vld.sshfl [vmem:[#allocation2] sm:$0x33 pattern:$0x76325410]  ;;  %v273_v13 = vld [vmem:[#allocation7] sm:$0xff]  ;;  %v274_v14 = vld [vmem:[#allocation7 + $0x8] sm:$0xff] }
  0x4f   :  { %v90_v15 = vcombine.high %v484_v12, %v484_v12  ;;  %v631_v16 = vpack.c.bf16 %v274_v14, %v273_v13  ;;  %v275_v17 = vld [vmem:[#allocation7 + $0x10] sm:$0xff]  ;;  %v276_v18 = vld [vmem:[#allocation7 + $0x18] sm:$0xff]  ;;  %v701_v19 = vld [vmem:[#allocation5 + $0x28] sm:$0xff]   ;;  %v93_v34 = vpack.c.bf16 %v484_v12, %v484_v12 }
  0x50   :  { %507 = vmatpush3.bf16.msra.mxu0 %v693_v4  ;;  %v634_v21 = vpack.c.bf16 %v276_v18, %v275_v17  ;;  %v702_v22 = vld [vmem:[#allocation5 + $0x70] sm:$0xff]   ;;  %v277_v23 = vld [vmem:[#allocation7 + $0x20] sm:$0xff]  ;;  %v278_v24 = vld [vmem:[#allocation7 + $0x28] sm:$0xff] }
  0x51   :  { %508 = vmatprep.subr.bf16.mxu0 %v694_v5  ;;  %v94_v20 = vpack.c.bf16 %v90_v15, %v90_v15  ;;  %632 = vmatpush3.bf16.msra.mxu1 %v631_v16  ;;  %v703_v25 = vld [vmem:[#allocation5 + $0x30] sm:$0xff]   ;;  %v637_v26 = vpack.c.bf16 %v278_v24, %v277_v23  ;;  %v704_v27 = vld [vmem:[#allocation5 + $0x78] sm:$0xff]   ;;  %v281_v32 = vld [vmem:[#allocation7 + $0x40] sm:$0xff] }
  0x52   :  { %633 = vmatprep.subr.bf16.mxu1 %v832_v0  ;;  %v279_v28 = vld [vmem:[#allocation7 + $0x30] sm:$0xff]  ;;  %v280_v29 = vld [vmem:[#allocation7 + $0x38] sm:$0xff]  ;;  %v282_v33 = vld [vmem:[#allocation7 + $0x48] sm:$0xff] }
  0x53   :  { %262 = vmatprep.mubr.bf16.mxu0 %v94_v20  ;;  %v705_v30 = vld [vmem:[#allocation5 + $0x38] sm:$0xff]   ;;  %v640_v31 = vpack.c.bf16 %v280_v29, %v279_v28  ;;  %v643_v35 = vpack.c.bf16 %v282_v33, %v281_v32  ;;  %v283_v36 = vld [vmem:[#allocation7 + $0x50] sm:$0xff]  ;;  %v285_v39 = vld [vmem:[#allocation7 + $0x60] sm:$0xff] }
  0x54   :  { %509 = vmatpush3.bf16.msra.mxu0 %v695_v6  ;;  %v284_v37 = vld [vmem:[#allocation7 + $0x58] sm:$0xff]  ;;  %v286_v40 = vld [vmem:[#allocation7 + $0x68] sm:$0xff]  ;;  %v287_v42 = vld [vmem:[#allocation7 + $0x70] sm:$0xff] }
  0x55   :  { %510 = vmatprep.subr.bf16.mxu0 %v696_v7  ;;  %635 = vmatpush3.bf16.msra.mxu1 %v634_v21  ;;  %v646_v38 = vpack.c.bf16 %v284_v37, %v283_v36  ;;  %v649_v41 = vpack.c.bf16 %v286_v40, %v285_v39  ;;  %v288_v43 = vld [vmem:[#allocation7 + $0x78] sm:$0xff]  ;;  %v369_v46 = vld [vmem:[#allocation8] sm:$0xff]  ;;  %v370_v47 = vld [vmem:[#allocation8 + $0x8] sm:$0xff] }
  0x56   :  { %636 = vmatprep.subr.bf16.mxu1 %v832_v0  ;;  %v652_v44 = vpack.c.bf16 %v288_v43, %v287_v42  ;;  %v371_v48 = vld [vmem:[#allocation8 + $0x10] sm:$0xff]  ;;  %v655_v49 = vpack.c.bf16 %v370_v47, %v369_v46  ;;  %v372_v50 = vld [vmem:[#allocation8 + $0x18] sm:$0xff]  ;;  %v373_v52 = vld [vmem:[#allocation8 + $0x20] sm:$0xff] }
  0x57   :  { %v658_v51 = vpack.c.bf16 %v372_v50, %v371_v48  ;;  %v374_v53 = vld [vmem:[#allocation8 + $0x28] sm:$0xff]  ;;  %v375_v55 = vld [vmem:[#allocation8 + $0x30] sm:$0xff]  ;;  %v376_v56 = vld [vmem:[#allocation8 + $0x38] sm:$0xff] }
  0x58   :  { %511 = vmatpush3.bf16.msra.mxu0 %v697_v8  ;;  %v661_v54 = vpack.c.bf16 %v374_v53, %v373_v52  ;;  %v664_v57 = vpack.c.bf16 %v376_v56, %v375_v55  ;;  %v377_v58 = vld [vmem:[#allocation8 + $0x40] sm:$0xff]  ;;  %v378_v59 = vld [vmem:[#allocation8 + $0x48] sm:$0xff]  ;;  %v379_v61 = vld [vmem:[#allocation8 + $0x50] sm:$0xff] }
  0x59   :  { %512 = vmatprep.subr.bf16.mxu0 %v698_v9  ;;  %638 = vmatpush3.bf16.msra.mxu1 %v637_v26  ;;  %v667_v60 = vpack.c.bf16 %v378_v59, %v377_v58  ;;  %v380_v62 = vld [vmem:[#allocation8 + $0x58] sm:$0xff]  ;;  %v381_v1 = vld [vmem:[#allocation8 + $0x60] sm:$0xff]  ;;  %v382_v2 = vld [vmem:[#allocation8 + $0x68] sm:$0xff] }
  0x5a   :  { %639 = vmatprep.subr.bf16.mxu1 %v832_v0  ;;  %v670_v63 = vpack.c.bf16 %v380_v62, %v379_v61  ;;  %v673_v3 = vpack.c.bf16 %v382_v2, %v381_v1  ;;  %v485_v5 = vld [vmem:[%s963_s2] ss:$0 sm:$0xff]  ;;  %v383_v13 = vld [vmem:[#allocation8 + $0x70] sm:$0xff] }
  0x5b   :  { %v384_v14 = vld [vmem:[#allocation8 + $0x78] sm:$0xff] }
  0x5c   :  { %513 = vmatpush3.bf16.msra.mxu0 %v699_v10  ;;  %v676_v15 = vpack.c.bf16 %v384_v14, %v383_v13  ;;  %v503_v21 = vld [vmem:[%s967_s6] ss:$0 sm:$0xff] }
  0x5d   :  { %514 = vmatprep.subr.bf16.mxu0 %v700_v11  ;;  %641 = vmatpush3.bf16.msra.mxu1 %v640_v31 }
  0x5e   :  { %642 = vmatprep.subr.bf16.mxu1 %v832_v0 }
  0x60   :  { %515 = vmatpush3.bf16.msra.mxu0 %v701_v19 }
  0x61   :  { %516 = vmatprep.subr.bf16.mxu0 %v702_v22  ;;  %644 = vmatpush3.bf16.msra.mxu1 %v643_v35 }
  0x62   :  { %645 = vmatprep.subr.bf16.mxu1 %v832_v0 }
  0x64   :  { %517 = vmatpush3.bf16.msra.mxu0 %v703_v25 }
  0x65   :  { %518 = vmatprep.subr.bf16.mxu0 %v704_v27  ;;  %647 = vmatpush3.bf16.msra.mxu1 %v646_v38 }
  0x66   :  { %648 = vmatprep.subr.bf16.mxu1 %v832_v0 }
  0x68   :  { %519 = vmatpush3.bf16.msra.mxu0 %v705_v30 }
  0x69   :  { %654 = vmatprep.subr.bf16.mxu0 %v832_v0  ;;  %650 = vmatpush3.bf16.msra.mxu1 %v649_v41 }
  0x6a   :  { %651 = vmatprep.subr.bf16.mxu1 %v832_v0 }
  0x6b   :  { %263 = vmatmul.mubr.bf16.vlgmr.msra.gmra.mrb[0].mxu0 %v93_v34 }
  0x6c   :  { %627 = vmatprep.mubr.msk.f32.mxu0 %vm833_vm0, %v834_v45  ;;  %656 = vmatpush3.bf16.msra.mxu0 %v655_v49 }
  0x6d   :  { %653 = vmatpush3.bf16.msra.mxu1 %v652_v44  ;;  %657 = vmatprep.subr.bf16.mxu0 %v832_v0 }
  0x70   :  { %659 = vmatpush3.bf16.msra.mxu0 %v658_v51 }
  0x71   :  { %660 = vmatprep.subr.bf16.mxu0 %v832_v0 }
  0x74   :  { %662 = vmatpush3.bf16.msra.mxu0 %v661_v54 }
  0x75   :  { %663 = vmatprep.subr.bf16.mxu0 %v832_v0 }
  0x78   :  { %665 = vmatpush3.bf16.msra.mxu0 %v664_v57 }
  0x79   :  { %666 = vmatprep.subr.bf16.mxu0 %v832_v0 }
  0x7c   :  { %668 = vmatpush3.bf16.msra.mxu0 %v667_v60 }
  0x7d   :  { %669 = vmatprep.subr.bf16.mxu0 %v832_v0 }
  0x80   :  { %671 = vmatpush3.bf16.msra.mxu0 %v670_v63 }
  0x81   :  { %672 = vmatprep.subr.bf16.mxu0 %v832_v0 }
  0x84   :  { %674 = vmatpush3.bf16.msra.mxu0 %v673_v3 }
  0x85   :  { %675 = vmatprep.subr.bf16.mxu0 %v832_v0  ;;  %v502_v0 = vld [vmem:[%s965_s4] ss:$0 sm:$0xff]  ;;  %s794_s4 = scalar_lea.vmem %s474_s8, 16 }
  0x86   :  { %p795_p4 = scmp.ne.s32.totalorder %s474_s8, %s794_s4  ;;  %p800_p6 = scmp.lt.s32.totalorder %s798_s9, %s794_s4 }
  0x88   :  { %677 = vmatpush3.bf16.msra.mxu0 %v676_v15  ;;  %p801_p7 = por %p800_p6, %p799_p5 }
  0x8a   :  { %p802_p8 = pnand %p801_p7, %p795_p4 }
 0x13e   :  { %v520_v4 = vpop.f32.mrb[0].mxu0 }
 0x13f   :  { %v521_v6 = vpop.f32.mrb[1].mxu0 }
 0x140   :  { %v522_v7 = vadd.f32 %v521_v6, %v520_v4  ;;  %v523_v8 = vpop.f32.mrb[2].mxu0 }
 0x141   :  { %v524_v9 = vpop.f32.mrb[3].mxu0 }
 0x142   :  { %v265_v10 = vadd.f32 %v522_v7, %v485_v5 }
 0x144   :  { %vm270_vm1 = vcmp.gt.f32.partialorder %v265_v10, 0.0  ;;  %v271_v11 = vmul.f32 0.01, %v265_v10 }
 0x146   :  { %v272_v12 = vsel %vm270_vm1, %v265_v10, %v271_v11 }
 0x147   :  { %593 = vmatmul.mubr.f32.vlgmr.msra.gmra.mrb[0].mxu1 %v272_v12 }
 0x21a   :  { %v362_v16 = vpop.f32.mrb[0].mxu1 }
 0x21b   :  { %v363_v17 = vadd.f32 %v502_v0, %v362_v16  ;;  %v594_v18 = vpop.f32.mrb[1].mxu1 }
 0x21d   :  { %vm366_vm2 = vcmp.gt.f32.partialorder %v363_v17, 0.0  ;;  %v367_v19 = vmul.f32 0.01, %v363_v17 }
 0x21f   :  { %v368_v20 = vsel %vm366_vm2, %v363_v17, %v367_v19 }
 0x220   :  { %628 = vmatmul.mubr.f32.vlgmr.msra.gmra.mrb[4].mxu0 %v368_v20 }
 0x2f3   :  { %v458_v22 = vpop.f32.mrb[4].mxu0 }
 0x2f4   :  { %v459_v23 = vadd.f32 %v503_v21, %v458_v22  ;;  %v629_v24 = vpop.f32.mrb[5].mxu0 }
 0x2f6   :  { %vm462_vm3 = vcmp.gt.f32.partialorder %v459_v23, 0.0  ;;  %v463_v25 = vmul.f32 0.01, %v459_v23 }
 0x2f8   :  { %v464_v26 = vsel %vm462_vm3, %v459_v23, %v463_v25 }
 0x2f9   :  { %v465_v27 = vpack.c.bf16 %v464_v26, %v464_v26 }
 0x2fb   :  { %466 = vst [vmem:[#allocation10] sm:$0x1] %v465_v27 }
 0x2fc   :  { %805 = shalt.err (!%p802_p8)
}
 0x2fd   :  { %s806_s11 = scalar_lea.hbm %s968_s7, 16 }
 0x2fe   :  { %p807_p9 = scmp.ne.s32.totalorder %s968_s7, %s806_s11  ;;  %p810_p10 = scmp.lt.u32.totalorder %s806_s11, %s968_s7 }
 0x300   :  { %p812_p11 = pnand %p810_p10, %p807_p9 }
 0x302   :  { %815 = shalt.err (!%p812_p11)
}
 0x303   :  { %476 = dma.vmem_to_hbm [thread:$0]  %s474_s8, 16, %s968_s7, [#allocation4]  }
 0x304   :  { %822 = dma.done.wait [#allocation4], 16  }
 0x305   :  { %823 = vsyncadd [#allocation4], 4294967280 }
 0x306   :  { %480 = vsyncpa [#allocation3], 1 }
 0x307   :  { %481 = vsyncpa [#allocation6], 1 }
 0x308   :  { %482 = vsyncpa [#allocation9], 1 }
 0x309   :  { %483 = vsyncpa [#allocation4], 1 }

</bundles_post_ra>
